<compile_context>
chip_gen: v6e
topology: v6e:2x2x1
jax: 0.10.0
libtpu: 0.0.40
codegen_flags: <defaults>
</compile_context>

<pallas_src>
import functools
import math

import jax
import jax.numpy as jnp
from jax.experimental import pallas as pl
from jax.experimental.pallas import tpu as pltpu

LANES = 128


def _round_up(x, m):
    return ((x + m - 1) // m) * m


def _ffn_kernel(x_ref, w1_ref, b1_ref, w2_ref, b2_ref, g_ref, beta_ref,
                o_ref, acc_ref, xn_ref, *, eps, pre_norm, c_real):
    k = pl.program_id(1)
    nk = pl.num_programs(1)

    c_pad = x_ref.shape[-1]
    inv_c = 1.0 / float(c_real)
    needs_mask = (c_real != c_pad)
    lane_mask = None
    if needs_mask:
        lane_mask = jax.lax.broadcasted_iota(jnp.int32, (1, c_pad), 1) < c_real

    def layer_norm(v):
        mean = jnp.sum(v, axis=-1, keepdims=True) * inv_c
        cent = v - mean
        if needs_mask:
            cent = jnp.where(lane_mask, cent, 0.0)
        var = jnp.sum(cent * cent, axis=-1, keepdims=True) * inv_c
        return (cent * jax.lax.rsqrt(var + eps)
                * g_ref[...].astype(jnp.float32)
                + beta_ref[...].astype(jnp.float32))

    @pl.when(k == 0)
    def _():
        acc_ref[...] = jnp.zeros_like(acc_ref)
        x = x_ref[...].astype(jnp.float32)
        xn_ref[...] = layer_norm(x) if pre_norm else x

    # fc1 tile: cast the LHS to the weight dtype so bf16 weights hit the MXU
    # natively; accumulate in f32.
    h = jnp.dot(xn_ref[...].astype(w1_ref.dtype), w1_ref[...],
                preferred_element_type=jnp.float32)
    h = h + b1_ref[...].astype(jnp.float32)
    # Exact (erf) GELU, matching torch nn.GELU() default.
    h = 0.5 * h * (1.0 + jax.lax.erf(h * (1.0 / math.sqrt(2.0))))
    # activation_dropout (p=0 / eval) == identity

    # fc2 partial product, accumulated across the H grid axis.
    acc_ref[...] += jnp.dot(h.astype(w2_ref.dtype), w2_ref[...],
                            preferred_element_type=jnp.float32)

    @pl.when(k == nk - 1)
    def _():
        out = acc_ref[...] + b2_ref[...].astype(jnp.float32)
        # hidden dropout (p=0 / eval) == identity
        out = out + x_ref[...].astype(jnp.float32)   # residual, re-read from VMEM
        if not pre_norm:
            out = layer_norm(out)
        o_ref[...] = out.astype(o_ref.dtype)


def positionwise_ffn(data, params, *, eps=1e-5, pre_norm=True,
                     row_tile=256, h_tile=512):
    """data: (B, S, C). Returns (B, S, C). Weights may be f32 or bf16."""
    B, S, C = data.shape
    w1, b1 = params["w1"], params["b1"]
    w2, b2 = params["w2"], params["b2"]
    gamma, beta = params["ln_gamma"], params["ln_beta"]
    H = w1.shape[1]
    R = B * S

    # Lane-dense channel / intermediate dims (multiples of 128).
    C_pad = _round_up(C, LANES)
    h_tile = min(_round_up(h_tile, LANES), _round_up(H, LANES))
    H_pad = _round_up(H, h_tile)

    # Row tiling: big tiles to fill the MXU M dim, but keep >=2 row steps when
    # possible so both v7x TensorCores get work.
    row_tile = max(8, min(row_tile, _round_up(pl.cdiv(R, 2), 8)))
    R_pad = _round_up(R, row_tile)

    x2d = jnp.pad(data.reshape(R, C), ((0, R_pad - R), (0, C_pad - C)))
    w1_p = jnp.pad(w1, ((0, C_pad - C), (0, H_pad - H)))
    b1_p = jnp.pad(b1, (0, H_pad - H)).reshape(1, H_pad)
    w2_p = jnp.pad(w2, ((0, H_pad - H), (0, C_pad - C)))
    b2_p = jnp.pad(b2, (0, C_pad - C)).reshape(1, C_pad)
    g_p = jnp.pad(gamma, (0, C_pad - C)).reshape(1, C_pad)
    beta_p = jnp.pad(beta, (0, C_pad - C)).reshape(1, C_pad)

    grid = (R_pad // row_tile, H_pad // h_tile)

    kernel = functools.partial(_ffn_kernel, eps=float(eps),
                               pre_norm=bool(pre_norm), c_real=int(C))

    nbytes = lambda a: a.size * a.dtype.itemsize
    cost = pl.CostEstimate(
        flops=4 * R_pad * C_pad * H_pad,               # fc1 + fc2
        transcendentals=R_pad * H_pad,                 # erf inside GELU
        bytes_accessed=(2 * nbytes(x2d) + nbytes(w1_p) + nbytes(w2_p)
                        + nbytes(b1_p) + nbytes(b2_p) + nbytes(g_p)
                        + nbytes(beta_p)),
    )

    out2d = pl.pallas_call(
        kernel,
        out_shape=jax.ShapeDtypeStruct((R_pad, C_pad), data.dtype),
        grid_spec=pltpu.PrefetchScalarGridSpec(
            num_scalar_prefetch=0,
            grid=grid,
            in_specs=[
                pl.BlockSpec((row_tile, C_pad), lambda i, k: (i, 0)),  # x rows
                pl.BlockSpec((C_pad, h_tile), lambda i, k: (0, k)),    # w1 tile
                pl.BlockSpec((1, h_tile), lambda i, k: (0, k)),        # b1 tile
                pl.BlockSpec((h_tile, C_pad), lambda i, k: (k, 0)),    # w2 tile
                pl.BlockSpec((1, C_pad), lambda i, k: (0, 0)),         # b2
                pl.BlockSpec((1, C_pad), lambda i, k: (0, 0)),         # ln gamma
                pl.BlockSpec((1, C_pad), lambda i, k: (0, 0)),         # ln beta
            ],
            out_specs=pl.BlockSpec((row_tile, C_pad), lambda i, k: (i, 0)),
            scratch_shapes=[
                pltpu.VMEM((row_tile, C_pad), jnp.float32),  # fc2 accumulator
                pltpu.VMEM((row_tile, C_pad), jnp.float32),  # (pre-)normed input
            ],
        ),
        compiler_params=pltpu.CompilerParams(
            dimension_semantics=("parallel", "arbitrary"),
            vmem_limit_bytes=48 * 1024 * 1024,
        ),
        cost_estimate=cost,
    )(x2d, w1_p, b1_p, w2_p, b2_p, g_p, beta_p)

    return out2d[:R, :C].reshape(B, S, C)


def init_params(key, hidden_size, intermediate_size, dtype=jnp.float32):
    """Xavier-uniform weights (stored as (in, out)), zero biases, LN gamma=1/beta=0."""
    k1, k2 = jax.random.split(key)

    def xavier(k, fan_in, fan_out):
        bound = math.sqrt(6.0 / (fan_in + fan_out))
        return jax.random.uniform(k, (fan_in, fan_out), dtype, -bound, bound)

    return {
        "w1": xavier(k1, hidden_size, intermediate_size),
        "b1": jnp.zeros((intermediate_size,), dtype),
        "w2": xavier(k2, intermediate_size, hidden_size),
        "b2": jnp.zeros((hidden_size,), dtype),
        "ln_gamma": jnp.ones((hidden_size,), dtype),
        "ln_beta": jnp.zeros((hidden_size,), dtype),
    }


def _reference(data, params, *, eps=1e-5, pre_norm=True):
    """Plain-JAX f32 reference of the PyTorch forward (dropout p=0)."""
    p = jax.tree_util.tree_map(lambda a: a.astype(jnp.float32), params)

    def ln(v):
        mean = jnp.mean(v, axis=-1, keepdims=True)
        var = jnp.mean((v - mean) ** 2, axis=-1, keepdims=True)
        return (v - mean) / jnp.sqrt(var + eps) * p["ln_gamma"] + p["ln_beta"]

    residual = data
    x = ln(data) if pre_norm else data
    h = x @ p["w1"] + p["b1"]
    h = 0.5 * h * (1.0 + jax.lax.erf(h / math.sqrt(2.0)))
    out = h @ p["w2"] + p["b2"]
    out = out + residual
    if not pre_norm:
        out = ln(out)
    return out


if __name__ == "__main__":
    B, S, HIDDEN, INTER = 2, 8, 32, 64
    key = jax.random.PRNGKey(0)
    k_data, k_param = jax.random.split(key)

    data = jax.random.normal(k_data, (B, S, HIDDEN), jnp.float32)
    params = init_params(k_param, HIDDEN, INTER)

    # 1) f32 weights, pre-norm (matches the PyTorch module's default path).
    out = jax.block_until_ready(positionwise_ffn(data, params, eps=1e-5, pre_norm=True))
    ref = _reference(data, params, eps=1e-5, pre_norm=True)
    assert out.shape == (B, S, HIDDEN)
    assert jnp.allclose(out, ref, atol=2e-5, rtol=2e-5), "pre-norm f32 mismatch"

    # 2) post-norm variant.
    out_pn = jax.block_until_ready(positionwise_ffn(data, params, eps=1e-5, pre_norm=False))
    ref_pn = _reference(data, params, eps=1e-5, pre_norm=False)
    assert jnp.allclose(out_pn, ref_pn, atol=2e-5, rtol=2e-5), "post-norm f32 mismatch"

    # 3) bf16 weights into the MXU (f32 accumulation + f32 LN/GELU/residual).
    params_bf16 = jax.tree_util.tree_map(lambda a: a.astype(jnp.bfloat16), params)
    out_bf16 = jax.block_until_ready(
        positionwise_ffn(data, params_bf16, eps=1e-5, pre_norm=True))
    assert jnp.allclose(out_bf16, ref, atol=5e-2, rtol=5e-2), "bf16 mismatch"

    print("KERNEL_OK")
</pallas_src>

<mosaic_0001>
module attributes {stable_mosaic.version = 11 : i64} {
  func.func @_ffn_kernel(%arg0: i32, %arg1: i32, %arg2: memref<8x128xf32, #tpu.memory_space<vmem>>, %arg3: memref<128x128xf32, #tpu.memory_space<vmem>>, %arg4: memref<1x128xf32, #tpu.memory_space<vmem>>, %arg5: memref<128x128xf32, #tpu.memory_space<vmem>>, %arg6: memref<1x128xf32, #tpu.memory_space<vmem>>, %arg7: memref<1x128xf32, #tpu.memory_space<vmem>>, %arg8: memref<1x128xf32, #tpu.memory_space<vmem>>, %arg9: memref<8x128xf32, #tpu.memory_space<vmem>>, %arg10: memref<8x128xf32, #tpu.memory_space<vmem>>, %arg11: memref<8x128xf32, #tpu.memory_space<vmem>>) attributes {dimension_semantics = [#tpu.dimension_semantics<parallel>, #tpu.dimension_semantics<arbitrary>], iteration_bounds = array<i64: 2, 1>, scalar_prefetch = 0 : i64, scratch_operands = 2 : i64, tpu.core_type = #tpu.core_type<tc>, window_params = [{transform_indices = @transform_0, window_bounds = array<i64: 8, 128>}, {transform_indices = @transform_1, window_bounds = array<i64: 128, 128>}, {transform_indices = @transform_2, window_bounds = array<i64: 1, 128>}, {transform_indices = @transform_3, window_bounds = array<i64: 128, 128>}, {pipeline_mode = #tpu.pipeline_mode<synchronous>, transform_indices = @transform_4, window_bounds = array<i64: 1, 128>}, {pipeline_mode = #tpu.pipeline_mode<synchronous>, transform_indices = @transform_5, window_bounds = array<i64: 1, 128>}, {pipeline_mode = #tpu.pipeline_mode<synchronous>, transform_indices = @transform_6, window_bounds = array<i64: 1, 128>}, {transform_indices = @transform_7, window_bounds = array<i64: 8, 128>}]} {
    %0 = tpu.iota {dimensions = array<i32: 1>} : vector<1x128xi32>
    %c32_i32 = arith.constant 32 : i32
    %1 = vector.broadcast %c32_i32 : i32 to vector<1x128xi32>
    %2 = arith.cmpi slt, %0, %1 : vector<1x128xi32>
    %c0_i32 = arith.constant 0 : i32
    %3 = arith.cmpi eq, %arg1, %c0_i32 : i32
    %4 = arith.extui %3 : i1 to i32
    %c0_i32_0 = arith.constant 0 : i32
    %5 = arith.cmpi ne, %4, %c0_i32_0 : i32
    scf.if %5 {
      %cst_18 = arith.constant 0.000000e+00 : f32
      %28 = vector.broadcast %cst_18 : f32 to vector<8x128xf32>
      %c0_19 = arith.constant 0 : index
      %c0_20 = arith.constant 0 : index
      %29 = vector.load %arg10[%c0_19, %c0_20] : memref<8x128xf32, #tpu.memory_space<vmem>>, vector<8x128xf32>
      tpu.vector_store %arg10[%c0_19, %c0_20], %28 {strides = array<i32>} : memref<8x128xf32, #tpu.memory_space<vmem>>, vector<8x128xf32>,
      %c0_21 = arith.constant 0 : index
      %c0_22 = arith.constant 0 : index
      %30 = vector.load %arg2[%c0_21, %c0_22] : memref<8x128xf32, #tpu.memory_space<vmem>>, vector<8x128xf32>
      %cst_23 = arith.constant dense<0.000000e+00> : vector<8xf32>
      %31 = vector.multi_reduction <add>, %30, %cst_23 [1] : vector<8x128xf32> to vector<8xf32>
      %32 = vector.shape_cast %31 : vector<8xf32> to vector<8x1xf32>
      %cst_24 = arith.constant 3.125000e-02 : f32
      %33 = vector.broadcast %cst_24 : f32 to vector<8x1xf32>
      %34 = arith.mulf %32, %33 : vector<8x1xf32>
      %35 = vector.broadcast %34 : vector<8x1xf32> to vector<8x128xf32>
      %36 = arith.subf %30, %35 : vector<8x128xf32>
      %cst_25 = arith.constant 0.000000e+00 : f32
      %37 = vector.shape_cast %2 : vector<1x128xi1> to vector<1x128xi1>
      %38 = vector.broadcast %37 : vector<1x128xi1> to vector<8x128xi1>
      %39 = vector.broadcast %cst_25 : f32 to vector<8x128xf32>
      %40 = arith.select %38, %36, %39 : vector<8x128xi1>, vector<8x128xf32>
      %41 = arith.mulf %40, %40 : vector<8x128xf32>
      %cst_26 = arith.constant dense<0.000000e+00> : vector<8xf32>
      %42 = vector.multi_reduction <add>, %41, %cst_26 [1] : vector<8x128xf32> to vector<8xf32>
      %43 = vector.shape_cast %42 : vector<8xf32> to vector<8x1xf32>
      %cst_27 = arith.constant 3.125000e-02 : f32
      %44 = vector.broadcast %cst_27 : f32 to vector<8x1xf32>
      %45 = arith.mulf %43, %44 : vector<8x1xf32>
      %cst_28 = arith.constant 9.99999974E-6 : f32
      %46 = vector.broadcast %cst_28 : f32 to vector<8x1xf32>
      %47 = arith.addf %45, %46 : vector<8x1xf32>
      %48 = math.rsqrt %47 : vector<8x1xf32>
      %49 = vector.broadcast %48 : vector<8x1xf32> to vector<8x128xf32>
      %50 = arith.mulf %40, %49 : vector<8x128xf32>
      %c0_29 = arith.constant 0 : index
      %c0_30 = arith.constant 0 : index
      %51 = vector.load %arg7[%c0_29, %c0_30] : memref<1x128xf32, #tpu.memory_space<vmem>>, vector<1x128xf32>
      %52 = vector.broadcast %51 : vector<1x128xf32> to vector<8x128xf32>
      %53 = arith.mulf %50, %52 : vector<8x128xf32>
      %c0_31 = arith.constant 0 : index
      %c0_32 = arith.constant 0 : index
      %54 = vector.load %arg8[%c0_31, %c0_32] : memref<1x128xf32, #tpu.memory_space<vmem>>, vector<1x128xf32>
      %55 = vector.broadcast %54 : vector<1x128xf32> to vector<8x128xf32>
      %56 = arith.addf %53, %55 : vector<8x128xf32>
      %c0_33 = arith.constant 0 : index
      %c0_34 = arith.constant 0 : index
      %57 = vector.load %arg11[%c0_33, %c0_34] : memref<8x128xf32, #tpu.memory_space<vmem>>, vector<8x128xf32>
      tpu.vector_store %arg11[%c0_33, %c0_34], %56 {strides = array<i32>} : memref<8x128xf32, #tpu.memory_space<vmem>>, vector<8x128xf32>,
    } else {
    }
    %c0 = arith.constant 0 : index
    %c0_1 = arith.constant 0 : index
    %6 = vector.load %arg11[%c0, %c0_1] : memref<8x128xf32, #tpu.memory_space<vmem>>, vector<8x128xf32>
    %c0_2 = arith.constant 0 : index
    %c0_3 = arith.constant 0 : index
    %7 = vector.load %arg3[%c0_2, %c0_3] : memref<128x128xf32, #tpu.memory_space<vmem>>, vector<128x128xf32>
    %cst = arith.constant dense<0.000000e+00> : vector<8x128xf32>
    %8 = tpu.matmul %6, %7, %cst {dimension_numbers = #tpu.dot_dimension_numbers<[1], [0], [0], [1], [0, 0, 1, 1], [], []>} : vector<8x128xf32>, vector<128x128xf32>, vector<8x128xf32> -> vector<8x128xf32>
    %c0_4 = arith.constant 0 : index
    %c0_5 = arith.constant 0 : index
    %9 = vector.load %arg4[%c0_4, %c0_5] : memref<1x128xf32, #tpu.memory_space<vmem>>, vector<1x128xf32>
    %10 = vector.broadcast %9 : vector<1x128xf32> to vector<8x128xf32>
    %11 = arith.addf %8, %10 : vector<8x128xf32>
    %cst_6 = arith.constant 5.000000e-01 : f32
    %12 = vector.broadcast %cst_6 : f32 to vector<8x128xf32>
    %13 = arith.mulf %12, %11 : vector<8x128xf32>
    %cst_7 = arith.constant 0.707106769 : f32
    %14 = vector.broadcast %cst_7 : f32 to vector<8x128xf32>
    %15 = arith.mulf %11, %14 : vector<8x128xf32>
    %16 = math.erf %15 : vector<8x128xf32>
    %cst_8 = arith.constant 1.000000e+00 : f32
    %17 = vector.broadcast %cst_8 : f32 to vector<8x128xf32>
    %18 = arith.addf %17, %16 : vector<8x128xf32>
    %19 = arith.mulf %13, %18 : vector<8x128xf32>
    %c0_9 = arith.constant 0 : index
    %c0_10 = arith.constant 0 : index
    %20 = vector.load %arg10[%c0_9, %c0_10] : memref<8x128xf32, #tpu.memory_space<vmem>>, vector<8x128xf32>
    %c0_11 = arith.constant 0 : index
    %c0_12 = arith.constant 0 : index
    %21 = vector.load %arg5[%c0_11, %c0_12] : memref<128x128xf32, #tpu.memory_space<vmem>>, vector<128x128xf32>
    %cst_13 = arith.constant dense<0.000000e+00> : vector<8x128xf32>
    %22 = tpu.matmul %19, %21, %cst_13 {dimension_numbers = #tpu.dot_dimension_numbers<[1], [0], [0], [1], [0, 0, 1, 1], [], []>} : vector<8x128xf32>, vector<128x128xf32>, vector<8x128xf32> -> vector<8x128xf32>
    %23 = arith.addf %20, %22 : vector<8x128xf32>
    %c0_14 = arith.constant 0 : index
    %c0_15 = arith.constant 0 : index
    %24 = vector.load %arg10[%c0_14, %c0_15] : memref<8x128xf32, #tpu.memory_space<vmem>>, vector<8x128xf32>
    tpu.vector_store %arg10[%c0_14, %c0_15], %23 {strides = array<i32>} : memref<8x128xf32, #tpu.memory_space<vmem>>, vector<8x128xf32>,
    %c0_i32_16 = arith.constant 0 : i32
    %25 = arith.cmpi eq, %arg1, %c0_i32_16 : i32
    %26 = arith.extui %25 : i1 to i32
    %c0_i32_17 = arith.constant 0 : i32
    %27 = arith.cmpi ne, %26, %c0_i32_17 : i32
    scf.if %27 {
      %c0_18 = arith.constant 0 : index
      %c0_19 = arith.constant 0 : index
      %28 = vector.load %arg10[%c0_18, %c0_19] : memref<8x128xf32, #tpu.memory_space<vmem>>, vector<8x128xf32>
      %c0_20 = arith.constant 0 : index
      %c0_21 = arith.constant 0 : index
      %29 = vector.load %arg6[%c0_20, %c0_21] : memref<1x128xf32, #tpu.memory_space<vmem>>, vector<1x128xf32>
      %30 = vector.broadcast %29 : vector<1x128xf32> to vector<8x128xf32>
      %31 = arith.addf %28, %30 : vector<8x128xf32>
      %c0_22 = arith.constant 0 : index
      %c0_23 = arith.constant 0 : index
      %32 = vector.load %arg2[%c0_22, %c0_23] : memref<8x128xf32, #tpu.memory_space<vmem>>, vector<8x128xf32>
      %33 = arith.addf %31, %32 : vector<8x128xf32>
      %c0_24 = arith.constant 0 : index
      %c0_25 = arith.constant 0 : index
      %34 = vector.load %arg9[%c0_24, %c0_25] : memref<8x128xf32, #tpu.memory_space<vmem>>, vector<8x128xf32>
      tpu.vector_store %arg9[%c0_24, %c0_25], %33 {strides = array<i32>} : memref<8x128xf32, #tpu.memory_space<vmem>>, vector<8x128xf32>,
    } else {
    }
    return
  }
  func.func @transform_0(%arg0: i32, %arg1: i32) -> (i32, i32) {
    %c0_i32 = arith.constant 0 : i32
    %c0_i32_0 = arith.constant 0 : i32
    return %arg0, %c0_i32 : i32, i32
  }
  func.func @transform_1(%arg0: i32, %arg1: i32) -> (i32, i32) {
    %c0_i32 = arith.constant 0 : i32
    %c0_i32_0 = arith.constant 0 : i32
    return %c0_i32, %arg1 : i32, i32
  }
  func.func @transform_2(%arg0: i32, %arg1: i32) -> (i32, i32) {
    %c0_i32 = arith.constant 0 : i32
    %c0_i32_0 = arith.constant 0 : i32
    return %c0_i32, %arg1 : i32, i32
  }
  func.func @transform_3(%arg0: i32, %arg1: i32) -> (i32, i32) {
    %c0_i32 = arith.constant 0 : i32
    %c0_i32_0 = arith.constant 0 : i32
    return %arg1, %c0_i32 : i32, i32
  }
  func.func @transform_4(%arg0: i32, %arg1: i32) -> (i32, i32) {
    %c0_i32 = arith.constant 0 : i32
    %c0_i32_0 = arith.constant 0 : i32
    %c0_i32_1 = arith.constant 0 : i32
    return %c0_i32, %c0_i32_0 : i32, i32
  }
  func.func @transform_5(%arg0: i32, %arg1: i32) -> (i32, i32) {
    %c0_i32 = arith.constant 0 : i32
    %c0_i32_0 = arith.constant 0 : i32
    %c0_i32_1 = arith.constant 0 : i32
    return %c0_i32, %c0_i32_0 : i32, i32
  }
  func.func @transform_6(%arg0: i32, %arg1: i32) -> (i32, i32) {
    %c0_i32 = arith.constant 0 : i32
    %c0_i32_0 = arith.constant 0 : i32
    %c0_i32_1 = arith.constant 0 : i32
    return %c0_i32, %c0_i32_0 : i32, i32
  }
  func.func @transform_7(%arg0: i32, %arg1: i32) -> (i32, i32) {
    %c0_i32 = arith.constant 0 : i32
    %c0_i32_0 = arith.constant 0 : i32
    return %arg0, %c0_i32 : i32, i32
  }
}

</mosaic_0001>

<bundles_post_ra>
// kernel: tpu_custom_call.1
= control target key start
LH: loop header
LB: loop body
LE: loop exit
PB: predicated region body
PF: predicated region fallthrough
CT: control target
= control target key end

     0   :  { %s1395_s0 = inlined_call_operand.hbm [shape: f32[16,128], index: 0, kind: input, shape index: {}]   ;;  %s1396_s1 = inlined_call_operand.hbm [shape: f32[128,128], index: 1, kind: input, shape index: {}]   ;;  %s1397_s2 = inlined_call_operand.vmem [shape: f32[1,128], index: 2, kind: input, shape index: {}]   ;;  %s1398_s3 = inlined_call_operand.hbm [shape: f32[128,128], index: 3, kind: input, shape index: {}]   ;;  %s1399_s4 = inlined_call_operand.vmem [shape: f32[1,128], index: 4, kind: input, shape index: {}]   ;;  %s1400_s5 = inlined_call_operand.vmem [shape: f32[1,128], index: 5, kind: input, shape index: {}]   ;;  %s1401_s6 = inlined_call_operand.vmem [shape: f32[1,128], index: 6, kind: input, shape index: {}]   ;;  %s1402_s7 = inlined_call_operand.hbm [shape: f32[16,128], index: 7, kind: output, shape index: {}]  }
   0x1   :  { %1407 = sst [smem:[#allocation15_spill]] %s1396_s1 }
   0x2   :  { %1408 = sst [smem:[#allocation16_spill]] %s1398_s3 }
   0x3   :  { %12 = vsyncpa [#allocation5], 0 }
   0x4   :  { %14 = vsyncpa [#allocation5 + $0x1], 0 }
   0x5   :  { %15 = vsyncpa [#allocation8], 0 }
   0x6   :  { %16 = vsyncpa [#allocation6], 0 }
   0x7   :  { %18 = vsyncpa [#allocation6 + $0x1], 0  ;;  %s1166_s24 = smov 0   ;;  %s1168_s25 = smov 0  }
   0x8   :  { %s1170_s26 = smov 0   ;;  %s1172_s27 = smov 0  }
   0x9   :  { %s1174_s28 = smov 0   ;;  %s1176_s29 = smov 0  }
   0xa LB: > { %s735_s30 = sadd.s32 4294967295, %s1116_s29   ;;  %s736_s8 = sadd.s32 4294967294, %s1116_s29   ;;  %s1116_s29 = sphi %s1176_s29, %s24_s29   ;;  %s1112_s28 = sphi %s1174_s28, %s1429_s28   ;;  %s1108_s27 = sphi %s1172_s27, %s1428_s27   ;;  %s1104_s26 = sphi %s1170_s26, %s1427_s26   ;;  %s1100_s25 = sphi %s1168_s25, %s1426_s25   ;;  %s1096_s24 = sphi %s1166_s24, %s1425_s24  }
   0xb   : > { %p56_p0 = scmp.ne.s32.totalorder %s1100_s25, %s1096_s24  ;;  %p1200_p1 = scmp.eq.s32.totalorder %s735_s30, 0 }
   0xc   : > { %p1204_p2 = scmp.eq.s32.totalorder %s735_s30, 1  ;;  %p227_p3 = scmp.eq.s32.totalorder %s736_s8, 1 }
   0xd   : > { %s1409_s9 = scalar_select %p1200_p1, 1, 0 }
   0xe   : > { %p1210_p4 = por %p1200_p1, %p56_p0  ;;  %p737_p5 = scmp.ge.s32.totalorder %s1116_s29, 1 }
   0xf   : > { %p1215_p6 = por %p227_p3, %p56_p0  ;;  %p234_p7 = scmp.lt.s32.totalorder %s1116_s29, 3 }
  0x10   : > { %s1411_s11 = scalar_select %p1210_p4, 1, 0 }
  0x11   : > { %s1412_s12 = scalar_select %p1215_p6, 1, 0 }
  0x12   : > { %p1220_p8 = pnand %p737_p5, %p234_p7  ;;  %s1118_s14 = smov [#allocation7]  }
  0x13   : > { %s248_s15 = sshll.u32 %s1118_s14, 4  ;;  %s1119_s17 = smov [#allocation9]   ;;  %s249_s15 = int_to_ptr.vmem [resolvable:$true] %s248_s15 }
  0x14   : > { %p873_p9 = pneg %p1220_p8  ;;  %s270_s18 = sshll.u32 %s1119_s17, 4  ;;  %s271_s18 = int_to_ptr.vmem [resolvable:$true] %s270_s18 }
  0x15   : > { %s963_s19 = scalar_lea.vmem %s249_s15, 2048  ;;  %p971_p5 = scmp.lt.s32.totalorder %s249_s15, %s249_s15 }
  0x16   : > { %p1229_p11 = pnand %p873_p9, %p1200_p1  ;;  %p964_p13 = scmp.ne.s32.totalorder %s249_s15, %s963_s19 }
  0x17   : > { %p972_p7 = scmp.lt.s32.totalorder %s963_s19, %s963_s19 }
  0x18   : > { %p954_p12 = pneg %p1229_p11 }
  0x19   : > { %p973_p10 = por %p972_p7, %p971_p5 }
  0x1a   : > { %p966_p0 = pnand %p964_p13, %p954_p12 }
  0x1c   : > { %p967_p3 = pneg %p966_p0 }
  0x1e   : > { %p974_p9 = pnand %p973_p10, %p967_p3 }
  0x20   : > { %977 = shalt.err (!%p974_p9)
}
  0x21   : > { %s1120_s20 = smov 128   ;;  %s1121_s21 = smov 8  }
  0x22   : > { %s1415_s1 = sld [smem:[#allocation15_spill]]  ;;  %s989_s30 = scalar_lea.vmem %s271_s18, 2048 }
  0x23   : > { %p990_p6 = scmp.ne.s32.totalorder %s271_s18, %s989_s30  ;;  %p997_p1 = scmp.lt.s32.totalorder %s271_s18, %s271_s18 }
  0x24   : > { %p998_p4 = scmp.lt.s32.totalorder %s989_s30, %s989_s30 }
  0x25   : > { %p992_p13 = pnand %p990_p6, %p954_p12 }
  0x26   : > { %p999_p5 = por %p998_p4, %p997_p1 }
  0x27   : > { %p993_p0 = pneg %p992_p13 }
  0x28   : > { %876 = dma.hbm_to_vmem [thread:$0]  (!%p1229_p11), %s1415_s1, 2048, %s249_s15, [#allocation8], %s1120_s20, %s1120_s20, %s1121_s21  }
  0x29   : > { %p1000_p10 = pnand %p999_p5, %p993_p0 }
  0x2b   : > { %1003 = shalt.err (!%p1000_p10)
}
  0x2c   : > { %s1416_s3 = sld [smem:[#allocation16_spill]]  ;;  %s36_s15 = sadd.s32 1, %s1112_s28 }
  0x2d   : > { %s43_s17 = sadd.s32 1, %s1104_s26  ;;  %p38_p1 = scmp.ge.s32.totalorder %s36_s15, 2 }
  0x2e   : > { %p50_p4 = scmp.ne.s32.totalorder %s1104_s26, %s1100_s25  ;;  %p51_p6 = scmp.eq.s32.totalorder %s1116_s29, 0 }
  0x2f   : > { %p890_p12 = scmp.lt.s32.totalorder %s1116_s29, 2  ;;  %s1431_s15 = smov (%p38_p1, %s36_s15), 0 }
  0x30   : > { %1417 = sst [smem:[#allocation14_spill]] %s1431_s15  ;;  %p52_p3 = por %p51_p6, %p50_p4 }
  0x31   : > { %p1261_p7 = por %p1204_p2, %p50_p4  ;;  %s40_s19 = ssub.s32 %s1112_s28, %s1431_s15 }
  0x32   : > { %879 = dma.hbm_to_vmem [thread:$0]  (!%p1229_p11), %s1416_s3, 2048, %s271_s18, [#allocation8], %s1120_s20, %s1120_s20, %s1121_s21  }
  0x33   : > { %s293_s22 = sand.u32 1, %s1104_s26   ;;  %p41_p9 = scmp.eq.s32.totalorder %s40_s19, 0 }
  0x34   : > { %s742_s18 = sshll.u32 %s293_s22, 3  ;;  %s743_s20 = sshll.u32 %s1112_s28, 7 }
  0x35   : > { %s1270_s21 = scalar_select %p41_p9, %s1104_s26, %s43_s17  }
  0x36   : > { %s302_s8 = scalar_lea.hbm %s1395_s0, %s743_s20  ;;  %s297_s14 = scalar_lea.vmem [#allocation4], %s742_s18 }
  0x37   : > { %s304_s1 = sshll.u32 %s297_s14, 4  ;;  %p1277_p11 = pnand %p890_p12, %p52_p3  ;;  %s305_s1 = int_to_ptr.vmem [resolvable:$true] %s304_s1 }
  0x38   : > { %s294_s3 = scalar_lea.sflag [#allocation5], %s293_s22  ;;  %s1017_s19 = scalar_lea.vmem %s305_s1, 128 }
  0x39   : > { %p1006_p2 = pneg %p1277_p11  ;;  %p1018_p13 = scmp.ne.s32.totalorder %s305_s1, %s1017_s19 }
  0x3a   : > { %s1122_s17 = smov [#allocation4]  }
  0x3b   : > { %p1020_p0 = pnand %p1018_p13, %p1006_p2  ;;  %s1022_s15 = sshll.u32 %s1122_s17, 4  ;;  %s1023_s15 = int_to_ptr.vmem [resolvable:$false] %s1022_s15 }
  0x3c   : > { %s1024_s20 = scalar_lea.vmem %s1023_s15, 256  ;;  %p1025_p10 = scmp.lt.s32.totalorder %s305_s1, %s1023_s15 }
  0x3d   : > { %p1021_p5 = pneg %p1020_p0  ;;  %p1026_p1 = scmp.lt.s32.totalorder %s1024_s20, %s1017_s19 }
  0x3f   : > { %p1027_p4 = por %p1026_p1, %p1025_p10 }
  0x41   : > { %p1028_p6 = pnand %p1027_p4, %p1021_p5 }
  0x43   : > { %1031 = shalt.err (!%p1028_p6)
}
  0x44   : > { %883 = dma.hbm_to_vmem [thread:$0]  (!%p1277_p11), %s302_s8, 128, %s305_s1, %s294_s3  }
  0x45   : > { %313 = sbr.rel (%p1220_p8) target bundleno = 811 (0x32b), region = 48  ;;  %s1288_s22 = sand.u32 (!%p1220_p8), 1, %s1100_s25  }
  0x46   : > { %s745_s18 = sshll.u32 (!%p1220_p8), %s1288_s22, 3  ;;  %s316_s23 = scalar_lea.sflag (!%p1220_p8), [#allocation5], %s1288_s22 }
  0x47   : > { %s319_s15 = scalar_lea.vmem (!%p1220_p8), [#allocation4], %s745_s18  ;;  %p1420_p12 = scmp.ne.s32.totalorder (!%p1220_p8), %s1411_s11, 0 }
  0x4a   : > { %1083 = dma.done.wait (%p1420_p12), %s316_s23, 128  }
  0x4b   : > { %1085 = vsyncadd (%p1420_p12), %s316_s23, 4294967168  ;;  %p1421_p3 = scmp.ne.s32.totalorder %s1409_s9, 0 }
  0x4d   : > { %1087 = dma.done.wait (%p1421_p3), [#allocation8], 4096  }
  0x4e   : > { %1089 = vsyncadd (%p1421_p3), [#allocation8], 4294963200  ;;  %v1302_v0 = vld [vmem:[%s319_s15] sm:$0xff]  ;;  %v1123_v2 = vmov 0.0   ;;  %v419_v4 = vld [vmem:[#allocation7 + $0x68] sm:$0xff]  ;;  %v365_v6 = vlaneseq  ;;  %vm1124_vm1 = vmmov 0  }
  0x4f   : > { %374 = vadd.xlane.f32.xlu0 %v1302_v0  ;;  %v421_v1 = vld [vmem:[#allocation7 + $0x78] sm:$0xff]  ;;  %791 = vmatprep.subr.mxu0 %v1123_v2  ;;  %v420_v3 = vld [vmem:[#allocation7 + $0x70] sm:$0xff]  ;;  %v418_v5 = vld [vmem:[#allocation7 + $0x60] sm:$0xff]  ;;  %s754_s10 = sshll.u32 %s1108_s27, 7  ;;  %s360_s19 = scalar_lea.vmem [#allocation10], %s745_s18 }
  0x50   : > { %826 = vmatprep.subr.mxu1 %v1123_v2  ;;  %792 = vmatpush3.msra.mxu0 %v421_v1  ;;  %v366_v7 = vand.u32 127, %v365_v6  ;;  %v417_v13 = vld [vmem:[#allocation7 + $0x58] sm:$0xff]  ;;  %v416_v14 = vld [vmem:[#allocation7 + $0x50] sm:$0xff]  ;;  %v415_v15 = vld [vmem:[#allocation7 + $0x48] sm:$0xff]  ;;  %s622_s17 = sshll.u32 %s360_s19, 4  ;;  %s620_s15 = scalar_lea.hbm %s1402_s7, %s754_s10  ;;  %s623_s17 = int_to_ptr.vmem [resolvable:$true] %s622_s17 }
  0x51   : > { %793 = vmatprep.subr.mxu0 %v1123_v2  ;;  %v414_v16 = vld [vmem:[#allocation7 + $0x40] sm:$0xff]  ;;  %823 = vmatprep.mubr.msk.f32.mxu0 %vm1124_vm1, %v1123_v2  ;;  %v413_v17 = vld [vmem:[#allocation7 + $0x38] sm:$0xff]  ;;  %v412_v18 = vld [vmem:[#allocation7 + $0x30] sm:$0xff]  ;;  %s609_s1 = scalar_lea.sflag [#allocation6], %s1288_s22  ;;  %s1032_s3 = scalar_lea.vmem %s623_s17, 128 }
  0x52   : > { %794 = vmatpush3.msra.mxu0 %v420_v3  ;;  %vm367_vm0 = vcmp.lt.s32.totalorder %v366_v7, 32  ;;  %858 = vmatprep.mubr.msk.f32.mxu1 %vm1124_vm1, %v1123_v2  ;;  %v411_v19 = vld [vmem:[#allocation7 + $0x28] sm:$0xff]  ;;  %v410_v20 = vld [vmem:[#allocation7 + $0x20] sm:$0xff]  ;;  %v409_v21 = vld [vmem:[#allocation7 + $0x18] sm:$0xff]  ;;  %p1033_p8 = scmp.ne.s32.totalorder %s623_s17, %s1032_s3  ;;  %s1125_s27 = smov [#allocation10]  }
  0x53   : > { %795 = vmatprep.subr.mxu0 %v1123_v2  ;;  %v408_v22 = vld [vmem:[#allocation7 + $0x10] sm:$0xff]  ;;  %v407_v23 = vld [vmem:[#allocation7 + $0x8] sm:$0xff]  ;;  %v406_v24 = vld [vmem:[#allocation7] sm:$0xff]  ;;  %s1036_s9 = sshll.u32 %s1125_s27, 4  ;;  %s1037_s9 = int_to_ptr.vmem [resolvable:$false] %s1036_s9 }
  0x54   : > { %796 = vmatpush3.msra.mxu0 %v419_v4  ;;  %v520_v25 = vld [vmem:[#allocation9 + $0x78] sm:$0xff]  ;;  %v519_v26 = vld [vmem:[#allocation9 + $0x70] sm:$0xff]  ;;  %v518_v27 = vld [vmem:[#allocation9 + $0x68] sm:$0xff]  ;;  %p1034_p9 = pnand %p1033_p8, %p1261_p7  ;;  %s1038_s18 = scalar_lea.vmem %s1037_s9, 256 }
  0x55   : > { %797 = vmatprep.subr.mxu0 %v1123_v2  ;;  %827 = vmatpush3.msra.mxu1 %v520_v25  ;;  %v517_v28 = vld [vmem:[#allocation9 + $0x60] sm:$0xff]  ;;  %v749_v33 = vld [vmem:[%s1400_s5] ss:$0 sm:$0xff]  ;;  %v516_v38 = vld [vmem:[#allocation9 + $0x58] sm:$0xff]  ;;  %p1039_p2 = scmp.lt.s32.totalorder %s623_s17, %s1037_s9  ;;  %p1040_p13 = scmp.lt.s32.totalorder %s1038_s18, %s1032_s3 }
  0x56   : > { %798 = vmatpush3.msra.mxu0 %v418_v5  ;;  %828 = vmatprep.subr.mxu1 %v1123_v2  ;;  %v750_v35 = vld [vmem:[%s1401_s6] ss:$0 sm:$0xff]  ;;  %v514_v40 = vld [vmem:[#allocation9 + $0x48] sm:$0xff]  ;;  %v513_v41 = vld [vmem:[#allocation9 + $0x40] sm:$0xff]  ;;  %p1035_p11 = pneg %p1034_p9 }
  0x57   : > { %799 = vmatprep.subr.mxu0 %v1123_v2  ;;  %829 = vmatpush3.msra.mxu1 %v519_v26  ;;  %v515_v39 = vld [vmem:[#allocation9 + $0x50] sm:$0xff]  ;;  %v512_v42 = vld [vmem:[#allocation9 + $0x38] sm:$0xff]  ;;  %v510_v44 = vld [vmem:[#allocation9 + $0x28] sm:$0xff]  ;;  %p1041_p0 = por %p1040_p13, %p1039_p2 }
  0x58   : > { %800 = vmatpush3.msra.mxu0 %v417_v13  ;;  %830 = vmatprep.subr.mxu1 %v1123_v2  ;;  %v511_v43 = vld [vmem:[#allocation9 + $0x30] sm:$0xff]  ;;  %v509_v45 = vld [vmem:[#allocation9 + $0x20] sm:$0xff]  ;;  %v508_v46 = vld [vmem:[#allocation9 + $0x18] sm:$0xff] }
  0x59   : > { %801 = vmatprep.subr.mxu0 %v1123_v2  ;;  %831 = vmatpush3.msra.mxu1 %v518_v27  ;;  %v507_v47 = vld [vmem:[#allocation9 + $0x10] sm:$0xff]  ;;  %v506_v48 = vld [vmem:[#allocation9 + $0x8] sm:$0xff]  ;;  %v505_v49 = vld [vmem:[#allocation9] sm:$0xff]  ;;  %p1042_p5 = pnand %p1041_p0, %p1035_p11 }
  0x5a   : > { %802 = vmatpush3.msra.mxu0 %v416_v14  ;;  %832 = vmatprep.subr.mxu1 %v1123_v2  ;;  %v751_v50 = vld [vmem:[%s1397_s2] ss:$0 sm:$0xff] }
  0x5b   : > { %803 = vmatprep.subr.mxu0 %v1123_v2  ;;  %833 = vmatpush3.msra.mxu1 %v517_v28  ;;  %v752_v59 = vld [vmem:[%s1399_s4] ss:$0 sm:$0xff] }
  0x5c   : > { %804 = vmatpush3.msra.mxu0 %v415_v15  ;;  %834 = vmatprep.subr.mxu1 %v1123_v2 }
  0x5d   : > { %805 = vmatprep.subr.mxu0 %v1123_v2  ;;  %835 = vmatpush3.msra.mxu1 %v516_v38 }
  0x5e   : > { %806 = vmatpush3.msra.mxu0 %v414_v16  ;;  %836 = vmatprep.subr.mxu1 %v1123_v2 }
  0x5f   : > { %807 = vmatprep.subr.mxu0 %v1123_v2  ;;  %837 = vmatpush3.msra.mxu1 %v515_v39 }
  0x60   : > { %808 = vmatpush3.msra.mxu0 %v413_v17  ;;  %838 = vmatprep.subr.mxu1 %v1123_v2 }
  0x61   : > { %809 = vmatprep.subr.mxu0 %v1123_v2  ;;  %839 = vmatpush3.msra.mxu1 %v514_v40 }
  0x62   : > { %810 = vmatpush3.msra.mxu0 %v412_v18  ;;  %840 = vmatprep.subr.mxu1 %v1123_v2 }
  0x63   : > { %811 = vmatprep.subr.mxu0 %v1123_v2  ;;  %841 = vmatpush3.msra.mxu1 %v513_v41 }
  0x64   : > { %812 = vmatpush3.msra.mxu0 %v411_v19  ;;  %842 = vmatprep.subr.mxu1 %v1123_v2 }
  0x65   : > { %813 = vmatprep.subr.mxu0 %v1123_v2  ;;  %843 = vmatpush3.msra.mxu1 %v512_v42 }
  0x66   : > { %814 = vmatpush3.msra.mxu0 %v410_v20  ;;  %844 = vmatprep.subr.mxu1 %v1123_v2 }
  0x67   : > { %815 = vmatprep.subr.mxu0 %v1123_v2  ;;  %845 = vmatpush3.msra.mxu1 %v511_v43 }
  0x68   : > { %816 = vmatpush3.msra.mxu0 %v409_v21  ;;  %846 = vmatprep.subr.mxu1 %v1123_v2 }
  0x69   : > { %817 = vmatprep.subr.mxu0 %v1123_v2  ;;  %847 = vmatpush3.msra.mxu1 %v510_v44 }
  0x6a   : > { %818 = vmatpush3.msra.mxu0 %v408_v22  ;;  %848 = vmatprep.subr.mxu1 %v1123_v2 }
  0x6b   : > { %819 = vmatprep.subr.mxu0 %v1123_v2  ;;  %849 = vmatpush3.msra.mxu1 %v509_v45 }
  0x6c   : > { %820 = vmatpush3.msra.mxu0 %v407_v23  ;;  %850 = vmatprep.subr.mxu1 %v1123_v2 }
  0x6d   : > { %821 = vmatprep.subr.mxu0 %v1123_v2  ;;  %851 = vmatpush3.msra.mxu1 %v508_v46 }
  0x6e   : > { %822 = vmatpush3.msra.mxu0 %v406_v24  ;;  %852 = vmatprep.subr.mxu1 %v1123_v2 }
  0x6f   : > { %853 = vmatpush3.msra.mxu1 %v507_v47 }
  0x70   : > { %854 = vmatprep.subr.mxu1 %v1123_v2 }
  0x71   : > { %855 = vmatpush3.msra.mxu1 %v506_v48 }
  0x72   : > { %856 = vmatprep.subr.mxu1 %v1123_v2 }
  0x73   : > { %857 = vmatpush3.msra.mxu1 %v505_v49 }
  0xd8   : > { %v375_v8 = vpop.xlane.xlu0 %374 }
  0xd9   : > { %v376_v9 = vmul.f32 0.03125, %v375_v8 }
  0xdb   : > { %v377_v10 = vsub.f32 %v1302_v0, %v376_v9 }
  0xdd   : > { %v380_v11 = vsel %vm367_vm0, %v377_v10, 0.0 }
  0xde   : > { %v381_v12 = vmul.f32 %v380_v11, %v380_v11 }
  0xe0   : > { %382 = vadd.xlane.f32.xlu0 %v381_v12 }
 0x169   : > { %v383_v29 = vpop.xlane.xlu0 %382 }
 0x16a   : > { %v384_v30 = vmul.f32 0.03125, %v383_v29 }
 0x16c   : > { %v385_v31 = vadd.f32 1e-05, %v384_v30 }
 0x16e   : > { %948 = vrsqrt.f32 %v385_v31 }
 0x17b   : > { %v949_v32 = vpop.eup %948 }
 0x17c   : > { %v387_v34 = vmul.f32 %v949_v32, %v380_v11 }
 0x17e   : > { %v395_v36 = vmul.f32 %v749_v33, %v387_v34 }
 0x180   : > { %v403_v37 = vadd.f32 %v750_v35, %v395_v36 }
 0x182   : > { %824 = vmatmul.mubr.f32.vlgmr.msra.gmra.mxu0 %v403_v37 }
 0x242   : > { %v495_v51 = vpop.f32.mrf.mxu0 }
 0x243   : > { %v496_v52 = vadd.f32 %v751_v50, %v495_v51 }
 0x244   : > { %v825_v53 = vpop.f32.mrf.mxu0 }
 0x245   : > { %v500_v54 = vmul.f32 0.70710677, %v496_v52  ;;  %v499_v56 = vmul.f32 0.5, %v496_v52 }
 0x247   : > { %950 = verf.f32 %v500_v54 }
 0x254   : > { %v951_v55 = vpop.eup %950 }
 0x255   : > { %v502_v57 = vadd.f32 1.0, %v951_v55 }
 0x257   : > { %v503_v58 = vmul.f32 %v502_v57, %v499_v56 }
 0x259   : > { %859 = vmatmul.mubr.f32.vlgmr.msra.gmra.mxu1 %v503_v58 }
 0x319   : > { %v587_v60 = vpop.f32.mrf.mxu1 }
 0x31a   : > { %v604_v61 = vadd.f32 %v752_v59, %v587_v60 }
 0x31b   : > { %v860_v62 = vpop.f32.mrf.mxu1 }
 0x31c   : > { %v606_v63 = vadd.f32 %v604_v61, %v1302_v0 }
 0x31e   : > { %607 = vst [vmem:[%s360_s19] sm:$0xff] %v606_v63 }
 0x31f   : > { %1045 = shalt.err (!%p1042_p5)
}
 0x320   : > { %s1046_s11 = scalar_lea.hbm %s620_s15, 128  ;;  %s1050_s30 = scalar_lea.hbm %s1402_s7, 256 }
 0x321   : > { %p1047_p10 = scmp.ne.s32.totalorder %s620_s15, %s1046_s11  ;;  %p1051_p6 = scmp.lt.s32.totalorder %s620_s15, %s1402_s7 }
 0x322   : > { %p1052_p12 = scmp.lt.s32.totalorder %s1050_s30, %s1046_s11 }
 0x323   : > { %p1048_p1 = pnand %p1047_p10, %p1261_p7 }
 0x324   : > { %p1053_p3 = por %p1052_p12, %p1051_p6 }
 0x325   : > { %p1049_p4 = pneg %p1048_p1 }
 0x327   : > { %p1054_p8 = pnand %p1053_p3, %p1049_p4 }
 0x329   : > { %1057 = shalt.err (!%p1054_p8)
}
 0x32a   : > { %871 = dma.vmem_to_hbm [thread:$0]  (%p1261_p7), %s623_s17, 128, %s620_s15, %s609_s1  }
 0x32b PF: > { %s634_s10 = sand.u32 1, %s1096_s24   ;;  %p1422_p9 = scmp.ne.s32.totalorder %s1412_s12, 0 }
 0x32c   : > { %p1423_p11 = scmp.ge.s32.totalorder %s1116_s29, 2  ;;  %s635_s19 = scalar_lea.sflag [#allocation6], %s634_s10 }
 0x32e   : > { %p885_p2 = pnand %p1423_p11, %p1422_p9 }
 0x330   : > { %p886_p13 = pneg %p885_p2 }
 0x332   : > { %1091 = dma.done.wait (%p886_p13), %s635_s19, 128  }
 0x333   : > { %1093 = vsyncadd (%p886_p13), %s635_s19, 4294967168  ;;  %s24_s29 = sadd.s32 1, %s1116_s29   ;;  %s1424_s16 = sld [smem:[#allocation14_spill]] }
 0x334   : > { %p21_p0 = scmp.ge.s32.totalorder %s24_s29, 4   ;;  %s1425_s24 = smov %s1100_s25 }
 0x335   : > { %s1426_s25 = smov %s1104_s26  ;;  %s1427_s26 = smov %s1270_s21 }
 0x336   : > { %s1428_s27 = smov %s1112_s28  ;;  %23 = sbr.rel (!%p21_p0) target bundleno = 10 (0xa), region = 114 }
 0x339   : > { %s1429_s28 = smov %s1424_s16 }
 0x33b   :  { %640 = vsyncpa [#allocation5], 1 }
 0x33c   :  { %642 = vsyncpa [#allocation5 + $0x1], 1 }
 0x33d   :  { %643 = vsyncpa [#allocation8], 1 }
 0x33e   :  { %644 = vsyncpa [#allocation6], 1 }
 0x33f   :  { %646 = vsyncpa [#allocation6 + $0x1], 1 }

</bundles_post_ra>
